<compile_context>
chip_gen: v7x
topology: tpu7x:2x2x1
jax: 0.10.0
libtpu: 0.0.40
codegen_flags: <defaults>
</compile_context>

<pallas_src>
import math

import jax
import jax.numpy as jnp
from jax.experimental import pallas as pl
from jax.experimental.pallas import tpu as pltpu


def _round_up(n, m):
    return ((n + m - 1) // m) * m


# -----------------------------------------------------------------------------
# Kernel: fused  (x @ W1^T + b1) -> ReLU -> (h @ W2^T + b2) -> Sigmoid
# -----------------------------------------------------------------------------
def mlp_kernel(x_ref, w1_ref, b1_ref, w2_ref, b2_ref, o_ref):
    x = x_ref[...]                                              # (tb, in_p) bf16
    h = jnp.dot(x, w1_ref[...],
                preferred_element_type=jnp.float32)             # (tb, hid_p) f32 acc
    h = jnp.maximum(h + b1_ref[...], 0.0)                       # bias + ReLU in f32 (v5e: no bf16 VPU)
    z = jnp.dot(h.astype(w2_ref.dtype), w2_ref[...],
                preferred_element_type=jnp.float32)             # (tb, out_p) f32 acc
    z = z + b2_ref[...]
    # sigmoid = 1 / (1 + exp(-z)); exp and approx reciprocal both run on the EUP slot.
    o_ref[...] = pl.reciprocal(1.0 + jnp.exp(-z), approx=True).astype(o_ref.dtype)


# -----------------------------------------------------------------------------
# Chip-aware configuration
# -----------------------------------------------------------------------------
def _chip_info():
    """Best-effort query -> (vmem_limit_bytes, multi_tensorcore)."""
    try:
        info = pltpu.get_tpu_info()
        cap = int(getattr(info, "vmem_capacity_bytes", 64 * 1024 * 1024))
    except Exception:  # interpret mode / query unsupported: be conservative
        cap = 64 * 1024 * 1024
    # v7x: 64 MiB VMEM per TensorCore, 2 TCs/chip.  v5e/v6e: 128 MiB, 1 TC.
    multi_tc = cap <= 64 * 1024 * 1024
    vmem_limit = max(32 * 1024 * 1024, min(cap * 3 // 4, 96 * 1024 * 1024))
    return vmem_limit, multi_tc


def _choose_tile_b(B, in_p, hid_p, out_p, vmem_limit, multi_tc):
    B16 = _round_up(B, 16)
    # Per-batch-row VMEM bytes per step: 2x-buffered bf16 x tile, 2x-buffered f32
    # output tile, plus the f32 hidden intermediate h.
    per_row = 2 * in_p * 2 + 2 * out_p * 4 + hid_p * 4
    # Single-buffered weight/bias slabs (bf16 weights, f32 biases).
    fixed = in_p * hid_p * 2 + hid_p * out_p * 2 + (hid_p + out_p) * 4
    budget = vmem_limit - fixed - 8 * 1024 * 1024        # scheduler/scratch headroom
    cap = (max(budget, 0) // max(per_row, 1)) // 16 * 16
    cap = max(16, min(512, cap))

    tile = min(B16, cap)
    if multi_tc and B16 >= 32:
        # v7x has 2 TensorCores: keep >=2 grid steps so both get work.
        tile = min(tile, _round_up((B16 + 1) // 2, 16))
    # Snap down to an MXU/sublane-friendly multiple (256 > 128 > 16).
    for m in (256, 128, 16):
        if tile >= m:
            tile = (tile // m) * m
            break
    return max(tile, 16)


# -----------------------------------------------------------------------------
# One-time parameter preparation (hoisted out of the per-call path)
# -----------------------------------------------------------------------------
def prepare_params(w1, b1, w2, b2, *, pad_in_dim=True):
    """Transpose, lane-pad and bf16-cast the Linear weights once.

    w1: (hidden, in_dim)   -- PyTorch Linear layout (out, in)
    b1: (hidden,)
    w2: (out_dim, hidden)
    b2: (out_dim,)
    Set pad_in_dim=False for very large memory-bound batches where 128-padding the
    K dimension would multiply x DMA traffic.
    """
    hid, in_dim = w1.shape
    out_dim = w2.shape[0]
    in_p = _round_up(in_dim, 128) if pad_in_dim else in_dim
    hid_p = _round_up(hid, 128)
    out_p = _round_up(out_dim, 128)

    w1_t = (jnp.zeros((in_p, hid_p), jnp.bfloat16)
            .at[:in_dim, :hid].set(w1.T.astype(jnp.bfloat16)))
    w2_t = (jnp.zeros((hid_p, out_p), jnp.bfloat16)
            .at[:hid, :out_dim].set(w2.T.astype(jnp.bfloat16)))
    b1_p = jnp.zeros((1, hid_p), jnp.float32).at[0, :hid].set(b1.astype(jnp.float32))
    b2_p = jnp.zeros((1, out_p), jnp.float32).at[0, :out_dim].set(b2.astype(jnp.float32))

    return dict(w1=w1_t, b1=b1_p, w2=w2_t, b2=b2_p,
                in_dim=in_dim, in_p=in_p, hid=hid, hid_p=hid_p,
                out_dim=out_dim, out_p=out_p)


# -----------------------------------------------------------------------------
# pallas_call wrapper
# -----------------------------------------------------------------------------
def _run_pallas(x_bf, p, tile_b, vmem_limit, single_buffer_weights):
    B_p, in_p = x_bf.shape
    hid_p, out_p = p["hid_p"], p["out_p"]
    grid = (B_p // tile_b,)

    const_kw = {}
    if single_buffer_weights:
        # Weights/biases never change across grid steps: single-buffer them to
        # halve their VMEM residency (matters on v7x's 64 MiB VMEM).
        const_kw = dict(pipeline_mode=pl.Buffered(1))

    def const_spec(shape):
        return pl.BlockSpec(shape, lambda i: (0, 0), **const_kw)

    flops = 2 * B_p * (in_p * hid_p + hid_p * out_p)
    bytes_accessed = (x_bf.size * 2 + p["w1"].size * 2 + p["w2"].size * 2
                      + (hid_p + out_p) * 4 + B_p * out_p * 4)

    return pl.pallas_call(
        mlp_kernel,
        # Output kept f32 for accuracy; switch to bf16 if downstream tolerates it
        # to halve output HBM writeback for large B.
        out_shape=jax.ShapeDtypeStruct((B_p, out_p), jnp.float32),
        grid_spec=pltpu.PrefetchScalarGridSpec(
            num_scalar_prefetch=0,
            grid=grid,
            in_specs=[
                pl.BlockSpec((tile_b, in_p), lambda i: (i, 0)),   # x tile per step
                const_spec((in_p, hid_p)),                        # W1^T (resident)
                const_spec((1, hid_p)),                           # b1 (f32)
                const_spec((hid_p, out_p)),                       # W2^T (resident)
                const_spec((1, out_p)),                           # b2 (f32)
            ],
            out_specs=pl.BlockSpec((tile_b, out_p), lambda i: (i, 0)),
        ),
        compiler_params=pltpu.CompilerParams(
            dimension_semantics=("parallel",),
            vmem_limit_bytes=vmem_limit,
        ),
        cost_estimate=pl.CostEstimate(
            flops=int(flops),
            transcendentals=int(B_p * out_p),
            bytes_accessed=int(bytes_accessed),
        ),
    )(x_bf, p["w1"], p["b1"], p["w2"], p["b2"])


def mlp_forward(x, params, *, tile_b=None):
    """Fused two-layer MLP forward (eval-mode dropout == identity).

    x      : (B, in_dim) f32
    params : output of prepare_params()
    """
    B, in_dim = x.shape
    assert in_dim == params["in_dim"]
    in_p, out_dim = params["in_p"], params["out_dim"]

    vmem_limit, multi_tc = _chip_info()
    if tile_b is None:
        tile_b = _choose_tile_b(B, in_p, params["hid_p"], params["out_p"],
                                vmem_limit, multi_tc)
    B_p = _round_up(B, tile_b)

    # Per-call input prep only: bf16 cast + zero-pad batch rows / K lanes if needed.
    x_bf = x.astype(jnp.bfloat16)
    if B_p != B or in_p != in_dim:
        x_bf = jnp.zeros((B_p, in_p), jnp.bfloat16).at[:B, :in_dim].set(x_bf)

    try:
        y_p = _run_pallas(x_bf, params, tile_b, vmem_limit, single_buffer_weights=True)
    except Exception:
        # pl.Buffered(1) not accepted by this jax version / backend: fall back to
        # default double-buffering of the constant weight blocks.
        y_p = _run_pallas(x_bf, params, tile_b, vmem_limit, single_buffer_weights=False)

    # Strip batch/lane padding in plain JAX.
    return y_p[:B, :out_dim]


def xavier_uniform(key, shape, gain):
    # PyTorch nn.init.xavier_uniform_ for a Linear weight of shape (fan_out, fan_in)
    fan_out, fan_in = shape
    bound = gain * math.sqrt(6.0 / (fan_in + fan_out))
    return jax.random.uniform(key, shape, jnp.float32, minval=-bound, maxval=bound)


if __name__ == "__main__":
    # Small shapes consistent with the module's forward.
    batch, input_dim, hidden_dim, output_dim = 16, 32, 64, 16

    key = jax.random.PRNGKey(0)
    k_x, k_w1, k_w2 = jax.random.split(key, 3)

    x = jax.random.normal(k_x, (batch, input_dim), jnp.float32)

    # Deterministic parameter init mirroring reset_parameters():
    #   xavier_uniform_(W1, gain=1/input_dim), xavier_uniform_(W2, gain=1/hidden_dim), biases zero.
    w1 = xavier_uniform(k_w1, (hidden_dim, input_dim), gain=1.0 / input_dim)   # PyTorch (out, in)
    w2 = xavier_uniform(k_w2, (output_dim, hidden_dim), gain=1.0 / hidden_dim)
    b1 = jnp.zeros((hidden_dim,), jnp.float32)
    b2 = jnp.zeros((output_dim,), jnp.float32)

    # One-time weight prep (transpose + pad + bf16 cast), then run the fused kernel.
    params = prepare_params(w1, b1, w2, b2)
    y = mlp_forward(x, params)
    y = jax.block_until_ready(y)

    # Pure-JAX f32 reference (eval-mode dropout == identity).
    ref = jax.nn.sigmoid(jnp.maximum(x @ w1.T + b1[None, :], 0.0) @ w2.T + b2[None, :])
    assert y.shape == ref.shape
    # Tolerance accounts for bf16 matmul operands + approximate reciprocal.
    assert jnp.allclose(y, ref, atol=1e-2, rtol=1e-2), "mismatch vs reference"

    print("KERNEL_OK")
</pallas_src>

<mosaic_0001>
module attributes {stable_mosaic.version = 11 : i64} {
  func.func @mlp_kernel(%arg0: i32, %arg1: memref<16x128xbf16, #tpu.memory_space<vmem>>, %arg2: memref<128x128xbf16, #tpu.memory_space<vmem>>, %arg3: memref<1x128xf32, #tpu.memory_space<vmem>>, %arg4: memref<128x128xbf16, #tpu.memory_space<vmem>>, %arg5: memref<1x128xf32, #tpu.memory_space<vmem>>, %arg6: memref<16x128xf32, #tpu.memory_space<vmem>>) attributes {dimension_semantics = [#tpu.dimension_semantics<parallel>], iteration_bounds = array<i64: 1>, scalar_prefetch = 0 : i64, scratch_operands = 0 : i64, tpu.core_type = #tpu.core_type<tc>, window_params = [{transform_indices = @transform_0, window_bounds = array<i64: 16, 128>}, {pipeline_mode = #tpu.pipeline_mode<synchronous>, transform_indices = @transform_1, window_bounds = array<i64: 128, 128>}, {pipeline_mode = #tpu.pipeline_mode<synchronous>, transform_indices = @transform_2, window_bounds = array<i64: 1, 128>}, {pipeline_mode = #tpu.pipeline_mode<synchronous>, transform_indices = @transform_3, window_bounds = array<i64: 128, 128>}, {pipeline_mode = #tpu.pipeline_mode<synchronous>, transform_indices = @transform_4, window_bounds = array<i64: 1, 128>}, {transform_indices = @transform_5, window_bounds = array<i64: 16, 128>}]} {
    %c0 = arith.constant 0 : index
    %c0_0 = arith.constant 0 : index
    %0 = vector.load %arg1[%c0, %c0_0] : memref<16x128xbf16, #tpu.memory_space<vmem>>, vector<16x128xbf16>
    %c0_1 = arith.constant 0 : index
    %c0_2 = arith.constant 0 : index
    %1 = vector.load %arg2[%c0_1, %c0_2] : memref<128x128xbf16, #tpu.memory_space<vmem>>, vector<128x128xbf16>
    %cst = arith.constant dense<0.000000e+00> : vector<16x128xf32>
    %2 = tpu.matmul %0, %1, %cst {dimension_numbers = #tpu.dot_dimension_numbers<[1], [0], [0], [1], [0, 0, 1, 1], [], []>} : vector<16x128xbf16>, vector<128x128xbf16>, vector<16x128xf32> -> vector<16x128xf32>
    %c0_3 = arith.constant 0 : index
    %c0_4 = arith.constant 0 : index
    %3 = vector.load %arg3[%c0_3, %c0_4] : memref<1x128xf32, #tpu.memory_space<vmem>>, vector<1x128xf32>
    %4 = vector.broadcast %3 : vector<1x128xf32> to vector<16x128xf32>
    %5 = arith.addf %2, %4 : vector<16x128xf32>
    %cst_5 = arith.constant 0.000000e+00 : f32
    %6 = vector.broadcast %cst_5 : f32 to vector<16x128xf32>
    %7 = arith.maximumf %5, %6 : vector<16x128xf32>
    %8 = arith.truncf %7 : vector<16x128xf32> to vector<16x128xbf16>
    %c0_6 = arith.constant 0 : index
    %c0_7 = arith.constant 0 : index
    %9 = vector.load %arg4[%c0_6, %c0_7] : memref<128x128xbf16, #tpu.memory_space<vmem>>, vector<128x128xbf16>
    %cst_8 = arith.constant dense<0.000000e+00> : vector<16x128xf32>
    %10 = tpu.matmul %8, %9, %cst_8 {dimension_numbers = #tpu.dot_dimension_numbers<[1], [0], [0], [1], [0, 0, 1, 1], [], []>} : vector<16x128xbf16>, vector<128x128xbf16>, vector<16x128xf32> -> vector<16x128xf32>
    %c0_9 = arith.constant 0 : index
    %c0_10 = arith.constant 0 : index
    %11 = vector.load %arg5[%c0_9, %c0_10] : memref<1x128xf32, #tpu.memory_space<vmem>>, vector<1x128xf32>
    %12 = vector.broadcast %11 : vector<1x128xf32> to vector<16x128xf32>
    %13 = arith.addf %10, %12 : vector<16x128xf32>
    %cst_11 = arith.constant 0.000000e+00 : f32
    %14 = vector.broadcast %cst_11 : f32 to vector<16x128xf32>
    %15 = arith.subf %14, %13 : vector<16x128xf32>
    %16 = math.exp %15 : vector<16x128xf32>
    %cst_12 = arith.constant 1.000000e+00 : f32
    %17 = vector.broadcast %cst_12 : f32 to vector<16x128xf32>
    %18 = arith.addf %17, %16 : vector<16x128xf32>
    %19 = tpu.reciprocal %18 {approx = true} : vector<16x128xf32> -> vector<16x128xf32>
    %c0_13 = arith.constant 0 : index
    %c0_14 = arith.constant 0 : index
    %20 = vector.load %arg6[%c0_13, %c0_14] : memref<16x128xf32, #tpu.memory_space<vmem>>, vector<16x128xf32>
    tpu.vector_store %arg6[%c0_13, %c0_14], %19 {strides = array<i32>} : memref<16x128xf32, #tpu.memory_space<vmem>>, vector<16x128xf32>,
    return
  }
  func.func @transform_0(%arg0: i32) -> (i32, i32) {
    %c0_i32 = arith.constant 0 : i32
    %c0_i32_0 = arith.constant 0 : i32
    return %arg0, %c0_i32 : i32, i32
  }
  func.func @transform_1(%arg0: i32) -> (i32, i32) {
    %c0_i32 = arith.constant 0 : i32
    %c0_i32_0 = arith.constant 0 : i32
    %c0_i32_1 = arith.constant 0 : i32
    return %c0_i32, %c0_i32_0 : i32, i32
  }
  func.func @transform_2(%arg0: i32) -> (i32, i32) {
    %c0_i32 = arith.constant 0 : i32
    %c0_i32_0 = arith.constant 0 : i32
    %c0_i32_1 = arith.constant 0 : i32
    return %c0_i32, %c0_i32_0 : i32, i32
  }
  func.func @transform_3(%arg0: i32) -> (i32, i32) {
    %c0_i32 = arith.constant 0 : i32
    %c0_i32_0 = arith.constant 0 : i32
    %c0_i32_1 = arith.constant 0 : i32
    return %c0_i32, %c0_i32_0 : i32, i32
  }
  func.func @transform_4(%arg0: i32) -> (i32, i32) {
    %c0_i32 = arith.constant 0 : i32
    %c0_i32_0 = arith.constant 0 : i32
    %c0_i32_1 = arith.constant 0 : i32
    return %c0_i32, %c0_i32_0 : i32, i32
  }
  func.func @transform_5(%arg0: i32) -> (i32, i32) {
    %c0_i32 = arith.constant 0 : i32
    %c0_i32_0 = arith.constant 0 : i32
    return %arg0, %c0_i32 : i32, i32
  }
}

module attributes {stable_mosaic.version = 11 : i64} {
  func.func @mlp_kernel(%arg0: i32, %arg1: memref<16x128xbf16, #tpu.memory_space<vmem>>, %arg2: memref<128x128xbf16, #tpu.memory_space<vmem>>, %arg3: memref<1x128xf32, #tpu.memory_space<vmem>>, %arg4: memref<128x128xbf16, #tpu.memory_space<vmem>>, %arg5: memref<1x128xf32, #tpu.memory_space<vmem>>, %arg6: memref<16x128xf32, #tpu.memory_space<vmem>>) attributes {dimension_semantics = [#tpu.dimension_semantics<parallel>], iteration_bounds = array<i64: 1>, scalar_prefetch = 0 : i64, scratch_operands = 0 : i64, tpu.core_type = #tpu.core_type<tc>, window_params = [{transform_indices = @transform_0, window_bounds = array<i64: 16, 128>}, {pipeline_mode = #tpu.pipeline_mode<synchronous>, transform_indices = @transform_1, window_bounds = array<i64: 128, 128>}, {pipeline_mode = #tpu.pipeline_mode<synchronous>, transform_indices = @transform_2, window_bounds = array<i64: 1, 128>}, {pipeline_mode = #tpu.pipeline_mode<synchronous>, transform_indices = @transform_3, window_bounds = array<i64: 128, 128>}, {pipeline_mode = #tpu.pipeline_mode<synchronous>, transform_indices = @transform_4, window_bounds = array<i64: 1, 128>}, {transform_indices = @transform_5, window_bounds = array<i64: 16, 128>}]} {
    %c0 = arith.constant 0 : index
    %c0_0 = arith.constant 0 : index
    %0 = vector.load %arg1[%c0, %c0_0] : memref<16x128xbf16, #tpu.memory_space<vmem>>, vector<16x128xbf16>
    %c0_1 = arith.constant 0 : index
    %c0_2 = arith.constant 0 : index
    %1 = vector.load %arg2[%c0_1, %c0_2] : memref<128x128xbf16, #tpu.memory_space<vmem>>, vector<128x128xbf16>
    %cst = arith.constant dense<0.000000e+00> : vector<16x128xf32>
    %2 = tpu.matmul %0, %1, %cst {dimension_numbers = #tpu.dot_dimension_numbers<[1], [0], [0], [1], [0, 0, 1, 1], [], []>} : vector<16x128xbf16>, vector<128x128xbf16>, vector<16x128xf32> -> vector<16x128xf32>
    %c0_3 = arith.constant 0 : index
    %c0_4 = arith.constant 0 : index
    %3 = vector.load %arg3[%c0_3, %c0_4] : memref<1x128xf32, #tpu.memory_space<vmem>>, vector<1x128xf32>
    %4 = vector.broadcast %3 : vector<1x128xf32> to vector<16x128xf32>
    %5 = arith.addf %2, %4 : vector<16x128xf32>
    %cst_5 = arith.constant 0.000000e+00 : f32
    %6 = vector.broadcast %cst_5 : f32 to vector<16x128xf32>
    %7 = arith.maximumf %5, %6 : vector<16x128xf32>
    %8 = arith.truncf %7 : vector<16x128xf32> to vector<16x128xbf16>
    %c0_6 = arith.constant 0 : index
    %c0_7 = arith.constant 0 : index
    %9 = vector.load %arg4[%c0_6, %c0_7] : memref<128x128xbf16, #tpu.memory_space<vmem>>, vector<128x128xbf16>
    %cst_8 = arith.constant dense<0.000000e+00> : vector<16x128xf32>
    %10 = tpu.matmul %8, %9, %cst_8 {dimension_numbers = #tpu.dot_dimension_numbers<[1], [0], [0], [1], [0, 0, 1, 1], [], []>} : vector<16x128xbf16>, vector<128x128xbf16>, vector<16x128xf32> -> vector<16x128xf32>
    %c0_9 = arith.constant 0 : index
    %c0_10 = arith.constant 0 : index
    %11 = vector.load %arg5[%c0_9, %c0_10] : memref<1x128xf32, #tpu.memory_space<vmem>>, vector<1x128xf32>
    %12 = vector.broadcast %11 : vector<1x128xf32> to vector<16x128xf32>
    %13 = arith.addf %10, %12 : vector<16x128xf32>
    %cst_11 = arith.constant 0.000000e+00 : f32
    %14 = vector.broadcast %cst_11 : f32 to vector<16x128xf32>
    %15 = arith.subf %14, %13 : vector<16x128xf32>
    %16 = math.exp %15 : vector<16x128xf32>
    %cst_12 = arith.constant 1.000000e+00 : f32
    %17 = vector.broadcast %cst_12 : f32 to vector<16x128xf32>
    %18 = arith.addf %17, %16 : vector<16x128xf32>
    %19 = tpu.reciprocal %18 {approx = true} : vector<16x128xf32> -> vector<16x128xf32>
    %c0_13 = arith.constant 0 : index
    %c0_14 = arith.constant 0 : index
    %20 = vector.load %arg6[%c0_13, %c0_14] : memref<16x128xf32, #tpu.memory_space<vmem>>, vector<16x128xf32>
    tpu.vector_store %arg6[%c0_13, %c0_14], %19 {strides = array<i32>} : memref<16x128xf32, #tpu.memory_space<vmem>>, vector<16x128xf32>,
    return
  }
  func.func @transform_0(%arg0: i32) -> (i32, i32) {
    %c0_i32 = arith.constant 0 : i32
    %c0_i32_0 = arith.constant 0 : i32
    return %arg0, %c0_i32 : i32, i32
  }
  func.func @transform_1(%arg0: i32) -> (i32, i32) {
    %c0_i32 = arith.constant 0 : i32
    %c0_i32_0 = arith.constant 0 : i32
    %c0_i32_1 = arith.constant 0 : i32
    return %c0_i32, %c0_i32_0 : i32, i32
  }
  func.func @transform_2(%arg0: i32) -> (i32, i32) {
    %c0_i32 = arith.constant 0 : i32
    %c0_i32_0 = arith.constant 0 : i32
    %c0_i32_1 = arith.constant 0 : i32
    return %c0_i32, %c0_i32_0 : i32, i32
  }
  func.func @transform_3(%arg0: i32) -> (i32, i32) {
    %c0_i32 = arith.constant 0 : i32
    %c0_i32_0 = arith.constant 0 : i32
    %c0_i32_1 = arith.constant 0 : i32
    return %c0_i32, %c0_i32_0 : i32, i32
  }
  func.func @transform_4(%arg0: i32) -> (i32, i32) {
    %c0_i32 = arith.constant 0 : i32
    %c0_i32_0 = arith.constant 0 : i32
    %c0_i32_1 = arith.constant 0 : i32
    return %c0_i32, %c0_i32_0 : i32, i32
  }
  func.func @transform_5(%arg0: i32) -> (i32, i32) {
    %c0_i32 = arith.constant 0 : i32
    %c0_i32_0 = arith.constant 0 : i32
    return %arg0, %c0_i32 : i32, i32
  }
}

</mosaic_0001>

<bundles_post_ra>
// kernel: tpu_custom_call.1
= control target key start
LH: loop header
LB: loop body
LE: loop exit
PB: predicated region body
PF: predicated region fallthrough
CT: control target
= control target key end

     0   :  { %10 = vsyncpa [#allocation3], 0  ;;  %s644_s0 = inlined_call_operand.hbm [shape: bf16[16,128], index: 0, kind: input, shape index: {}]   ;;  %s645_s1 = inlined_call_operand.hbm [shape: bf16[128,128], index: 1, kind: input, shape index: {}]   ;;  %s646_s2 = inlined_call_operand.vmem [shape: f32[1,128], index: 2, kind: input, shape index: {}]   ;;  %s647_s3 = inlined_call_operand.hbm [shape: bf16[128,128], index: 3, kind: input, shape index: {}]   ;;  %s648_s4 = inlined_call_operand.vmem [shape: f32[1,128], index: 4, kind: input, shape index: {}]   ;;  %s649_s5 = inlined_call_operand.hbm [shape: f32[16,128], index: 5, kind: output, shape index: {}]  }
   0x1   :  { %11 = vsyncpa [#allocation6], 0 }
   0x2   :  { %12 = vsyncpa [#allocation4], 0  ;;  %s534_s18 = smov [#allocation5]   ;;  %s535_s20 = smov [#allocation2]  }
   0x3   :  { %s30_s19 = sshll.u32 %s534_s18, 4  ;;  %s18_s21 = sshll.u32 %s535_s20, 4  ;;  %s31_s19 = int_to_ptr.vmem [resolvable:$true] %s30_s19  ;;  %s574_s21 = int_to_ptr.vmem [resolvable:$true] %s18_s21 }
   0x4   :  { %s440_s24 = scalar_lea.hbm %s645_s1, 1024 }
   0x5   :  { %p441_p0 = scmp.ne.s32.totalorder %s645_s1, %s440_s24  ;;  %p444_p1 = scmp.lt.u32.totalorder %s440_s24, %s645_s1 }
   0x7   :  { %p446_p2 = pnand %p444_p1, %p441_p0 }
   0x9   :  { %449 = shalt.err (!%p446_p2)
}
   0xa   :  { %s450_s29 = scalar_lea.vmem %s31_s19, 1024  ;;  %p455_p4 = scmp.lt.s32.totalorder %s31_s19, %s31_s19 }
   0xb   :  { %p451_p3 = scmp.ne.s32.totalorder %s31_s19, %s450_s29  ;;  %p456_p5 = scmp.lt.s32.totalorder %s450_s29, %s450_s29 }
   0xd   :  { %p457_p6 = por %p456_p5, %p455_p4 }
   0xf   :  { %p458_p7 = pnand %p457_p6, %p451_p3 }
  0x11   :  { %461 = shalt.err (!%p458_p7)
}
  0x12   :  { %s536_s30 = smov 64   ;;  %s537_s6 = smov 4  }
  0x13   :  { %36 = dma.hbm_to_vmem [thread:$0]  %s645_s1, 1024, %s31_s19, [#allocation6], %s536_s30, %s536_s30, %s537_s6  }
  0x14   :  { %s462_s11 = scalar_lea.hbm %s644_s0, 128 }
  0x15   :  { %p463_p8 = scmp.ne.s32.totalorder %s644_s0, %s462_s11  ;;  %p466_p9 = scmp.lt.u32.totalorder %s462_s11, %s644_s0 }
  0x17   :  { %p468_p10 = pnand %p466_p9, %p463_p8 }
  0x19   :  { %471 = shalt.err (!%p468_p10)
}
  0x1a   :  { %s472_s16 = scalar_lea.vmem %s574_s21, 128  ;;  %p477_p12 = scmp.lt.s32.totalorder %s574_s21, %s574_s21 }
  0x1b   :  { %p473_p11 = scmp.ne.s32.totalorder %s574_s21, %s472_s16  ;;  %p478_p13 = scmp.lt.s32.totalorder %s472_s16, %s472_s16 }
  0x1d   :  { %p479_p0 = por %p478_p13, %p477_p12 }
  0x1f   :  { %p480_p1 = pnand %p479_p0, %p473_p11 }
  0x21   :  { %483 = shalt.err (!%p480_p1)
}
  0x22   :  { %24 = dma.hbm_to_vmem [thread:$0]  %s644_s0, 128, %s574_s21, [#allocation3], %s536_s30, %s536_s30, %s537_s6  }
  0x23   :  { %s538_s18 = smov [#allocation7]   ;;  %s484_s23 = scalar_lea.hbm %s647_s3, 1024 }
  0x24   :  { %s44_s19 = sshll.u32 %s538_s18, 4  ;;  %p485_p2 = scmp.ne.s32.totalorder %s647_s3, %s484_s23  ;;  %s45_s19 = int_to_ptr.vmem [resolvable:$true] %s44_s19 }
  0x25   :  { %p488_p3 = scmp.lt.u32.totalorder %s484_s23, %s647_s3 }
  0x27   :  { %p490_p4 = pnand %p488_p3, %p485_p2 }
  0x29   :  { %493 = shalt.err (!%p490_p4)
}
  0x2a   :  { %s494_s28 = scalar_lea.vmem %s45_s19, 1024  ;;  %p499_p6 = scmp.lt.s32.totalorder %s45_s19, %s45_s19 }
  0x2b   :  { %p495_p5 = scmp.ne.s32.totalorder %s45_s19, %s494_s28  ;;  %p500_p7 = scmp.lt.s32.totalorder %s494_s28, %s494_s28 }
  0x2d   :  { %p501_p8 = por %p500_p7, %p499_p6 }
  0x2f   :  { %p502_p9 = pnand %p501_p8, %p495_p5 }
  0x31   :  { %505 = shalt.err (!%p502_p9)
}
  0x32   :  { %50 = dma.hbm_to_vmem [thread:$0]  %s647_s3, 1024, %s45_s19, [#allocation6], %s536_s30, %s536_s30, %s537_s6  }
  0x33   :  { %528 = dma.done.wait [#allocation3], 128  }
  0x34   :  { %529 = vsyncadd [#allocation3], 4294967168 }
  0x35   :  { %530 = dma.done.wait [#allocation6], 2048  }
  0x36   :  { %531 = vsyncadd [#allocation6], 4294965248  ;;  %v539_v0 = vmov 0.0   ;;  %vm540_vm0 = vmmov 0   ;;  %v415_v1 = vld [vmem:[#allocation5] sm:$0xff]   ;;  %v416_v2 = vld [vmem:[#allocation5 + $0x8] sm:$0xff]  }
  0x37   :  { %365 = vmatprep.subr.bf16.mxu0 %v539_v0  ;;  %381 = vmatprep.mubr.msk.bf16.mxu0 %vm540_vm0, %v539_v0  ;;  %v417_v3 = vld [vmem:[#allocation5 + $0x10] sm:$0xff]   ;;  %v424_v4 = vld [vmem:[#allocation7] sm:$0xff]   ;;  %v418_v5 = vld [vmem:[#allocation5 + $0x18] sm:$0xff]  }
  0x38   :  { %385 = vmatprep.subr.bf16.mxu1 %v539_v0  ;;  %401 = vmatprep.mubr.msk.bf16.mxu1 %vm540_vm0, %v539_v0  ;;  %v425_v6 = vld [vmem:[#allocation7 + $0x8] sm:$0xff]   ;;  %v419_v7 = vld [vmem:[#allocation5 + $0x20] sm:$0xff]   ;;  %v426_v8 = vld [vmem:[#allocation7 + $0x10] sm:$0xff]  }
  0x39   :  { %366 = vmatpush3.bf16.msra.mxu0 %v415_v1  ;;  %386 = vmatpush3.bf16.msra.mxu1 %v424_v4  ;;  %v420_v9 = vld [vmem:[#allocation5 + $0x28] sm:$0xff]   ;;  %v427_v10 = vld [vmem:[#allocation7 + $0x18] sm:$0xff]   ;;  %v421_v11 = vld [vmem:[#allocation5 + $0x30] sm:$0xff]  }
  0x3a   :  { %367 = vmatprep.subr.bf16.mxu0 %v539_v0  ;;  %387 = vmatprep.subr.bf16.mxu1 %v539_v0  ;;  %v428_v12 = vld [vmem:[#allocation7 + $0x20] sm:$0xff]   ;;  %v422_v13 = vld [vmem:[#allocation5 + $0x38] sm:$0xff]   ;;  %v429_v14 = vld [vmem:[#allocation7 + $0x28] sm:$0xff]  }
  0x3b   :  { %v423_v15 = vld [vmem:[#allocation2] sm:$0xff]   ;;  %v430_v16 = vld [vmem:[#allocation7 + $0x30] sm:$0xff]  }
  0x3c   :  { %v431_v17 = vld [vmem:[#allocation7 + $0x38] sm:$0xff]  }
  0x3d   :  { %368 = vmatpush3.bf16.msra.mxu0 %v416_v2  ;;  %388 = vmatpush3.bf16.msra.mxu1 %v425_v6  ;;  %v328_v18 = vld [vmem:[%s646_s2] ss:$0 sm:$0xff]  ;;  %s541_s2 = smov [#allocation8]  }
  0x3e   :  { %369 = vmatprep.subr.bf16.mxu0 %v539_v0  ;;  %389 = vmatprep.subr.bf16.mxu1 %v539_v0  ;;  %v338_v28 = vld [vmem:[%s648_s4] ss:$0 sm:$0xff]  ;;  %s315_s4 = sshll.u32 %s541_s2, 4  ;;  %s316_s4 = int_to_ptr.vmem [resolvable:$true] %s315_s4 }
  0x3f   :  { %s506_s7 = scalar_lea.vmem %s316_s4, 256  ;;  %p511_p11 = scmp.lt.s32.totalorder %s316_s4, %s316_s4 }
  0x40   :  { %p507_p10 = scmp.ne.s32.totalorder %s316_s4, %s506_s7  ;;  %p512_p12 = scmp.lt.s32.totalorder %s506_s7, %s506_s7 }
  0x41   :  { %370 = vmatpush3.bf16.msra.mxu0 %v417_v3  ;;  %390 = vmatpush3.bf16.msra.mxu1 %v426_v8 }
  0x42   :  { %371 = vmatprep.subr.bf16.mxu0 %v539_v0  ;;  %391 = vmatprep.subr.bf16.mxu1 %v539_v0  ;;  %p513_p13 = por %p512_p12, %p511_p11 }
  0x44   :  { %p514_p0 = pnand %p513_p13, %p507_p10 }
  0x45   :  { %372 = vmatpush3.bf16.msra.mxu0 %v418_v5  ;;  %392 = vmatpush3.bf16.msra.mxu1 %v427_v10 }
  0x46   :  { %373 = vmatprep.subr.bf16.mxu0 %v539_v0  ;;  %393 = vmatprep.subr.bf16.mxu1 %v539_v0 }
  0x49   :  { %374 = vmatpush3.bf16.msra.mxu0 %v419_v7  ;;  %394 = vmatpush3.bf16.msra.mxu1 %v428_v12 }
  0x4a   :  { %375 = vmatprep.subr.bf16.mxu0 %v539_v0  ;;  %395 = vmatprep.subr.bf16.mxu1 %v539_v0 }
  0x4d   :  { %376 = vmatpush3.bf16.msra.mxu0 %v420_v9  ;;  %396 = vmatpush3.bf16.msra.mxu1 %v429_v14 }
  0x4e   :  { %377 = vmatprep.subr.bf16.mxu0 %v539_v0  ;;  %397 = vmatprep.subr.bf16.mxu1 %v539_v0 }
  0x51   :  { %378 = vmatpush3.bf16.msra.mxu0 %v421_v11  ;;  %398 = vmatpush3.bf16.msra.mxu1 %v430_v16 }
  0x52   :  { %379 = vmatprep.subr.bf16.mxu0 %v539_v0  ;;  %399 = vmatprep.subr.bf16.mxu1 %v539_v0 }
  0x55   :  { %380 = vmatpush3.bf16.msra.mxu0 %v422_v13  ;;  %400 = vmatpush3.bf16.msra.mxu1 %v431_v17 }
  0x58   :  { %382 = vmatmul.mubr.bf16.vlgmr.msra.gmra.mrb[0].mxu0 %v423_v15 }
 0x12b   :  { %v176_v19 = vpop.f32.mrb[0].mxu0 }
 0x12c   :  { %v177_v20 = vadd.f32 %v328_v18, %v176_v19  ;;  %v383_v21 = vpop.f32.mrb[1].mxu0 }
 0x12d   :  { %v179_v22 = vpop.f32.mrb[2].mxu0 }
 0x12e   :  { %v180_v23 = vadd.f32 %v328_v18, %v179_v22  ;;  %v384_v24 = vpop.f32.mrb[3].mxu0  ;;  %v183_v25 = vmax.f32 %v177_v20, 0.0 }
 0x130   :  { %v184_v26 = vmax.f32 %v180_v23, 0.0 }
 0x132   :  { %v185_v27 = vpack.c.bf16 %v184_v26, %v183_v25 }
 0x134   :  { %402 = vmatmul.mubr.bf16.vlgmr.msra.gmra.mrb[0].mxu1 %v185_v27 }
 0x207   :  { %v291_v29 = vpop.f32.mrb[0].mxu1 }
 0x208   :  { %v292_v30 = vadd.f32 %v338_v28, %v291_v29  ;;  %v403_v31 = vpop.f32.mrb[1].mxu1 }
 0x209   :  { %v294_v32 = vpop.f32.mrb[2].mxu1 }
 0x20a   :  { %v298_v33 = vsub.f32 0.0, %v292_v30  ;;  %v295_v34 = vadd.f32 %v338_v28, %v294_v32  ;;  %v404_v35 = vpop.f32.mrb[3].mxu1 }
 0x20c   :  { %v300_v36 = vmul.f32 1.442695, %v298_v33  ;;  %v299_v37 = vsub.f32 0.0, %v295_v34 }
 0x20e   :  { %432 = vpow2.f32 %v300_v36  ;;  %v302_v38 = vmul.f32 1.442695, %v299_v37 }
 0x210   :  { %434 = vpow2.f32 %v302_v38 }
 0x218   :  { %v433_v39 = vpop.eup %432 }
 0x219   :  { %v304_v40 = vadd.f32 1.0, %v433_v39 }
 0x21a   :  { %v435_v41 = vpop.eup %434 }
 0x21b   :  { %436 = vrcp.f32 %v304_v40  ;;  %v305_v42 = vadd.f32 1.0, %v435_v41 }
 0x21d   :  { %438 = vrcp.f32 %v305_v42 }
 0x225   :  { %v437_v43 = vpop.eup %436 }
 0x226   :  { %308 = vst [vmem:[#allocation8] sm:$0xff] %v437_v43 }
 0x227   :  { %v439_v44 = vpop.eup %438 }
 0x228   :  { %309 = vst [vmem:[#allocation8 + $0x8] sm:$0xff] %v439_v44 }
 0x229   :  { %517 = shalt.err (!%p514_p0)
}
 0x22a   :  { %s518_s10 = scalar_lea.hbm %s649_s5, 256 }
 0x22b   :  { %p519_p1 = scmp.ne.s32.totalorder %s649_s5, %s518_s10  ;;  %p522_p2 = scmp.lt.u32.totalorder %s518_s10, %s649_s5 }
 0x22d   :  { %p524_p3 = pnand %p522_p2, %p519_p1 }
 0x22f   :  { %527 = shalt.err (!%p524_p3)
}
 0x230   :  { %s542_s15 = smov 128   ;;  %s543_s16 = smov 8  }
 0x231   :  { %321 = dma.vmem_to_hbm [thread:$0]  %s316_s4, 256, %s649_s5, [#allocation4], %s542_s15, %s542_s15, %s543_s16  }
 0x232   :  { %532 = dma.done.wait [#allocation4], 256  }
 0x233   :  { %533 = vsyncadd [#allocation4], 4294967040 }
 0x234   :  { %325 = vsyncpa [#allocation3], 1 }
 0x235   :  { %326 = vsyncpa [#allocation6], 1 }
 0x236   :  { %327 = vsyncpa [#allocation4], 1 }

// kernel: tpu_custom_call.1
= control target key start
LH: loop header
LB: loop body
LE: loop exit
PB: predicated region body
PF: predicated region fallthrough
CT: control target
= control target key end

     0   :  { %10 = vsyncpa [#allocation3], 0  ;;  %s644_s0 = inlined_call_operand.hbm [shape: bf16[16,128], index: 0, kind: input, shape index: {}]   ;;  %s645_s1 = inlined_call_operand.hbm [shape: bf16[128,128], index: 1, kind: input, shape index: {}]   ;;  %s646_s2 = inlined_call_operand.vmem [shape: f32[1,128], index: 2, kind: input, shape index: {}]   ;;  %s647_s3 = inlined_call_operand.hbm [shape: bf16[128,128], index: 3, kind: input, shape index: {}]   ;;  %s648_s4 = inlined_call_operand.vmem [shape: f32[1,128], index: 4, kind: input, shape index: {}]   ;;  %s649_s5 = inlined_call_operand.hbm [shape: f32[16,128], index: 5, kind: output, shape index: {}]  }
   0x1   :  { %11 = vsyncpa [#allocation6], 0 }
   0x2   :  { %12 = vsyncpa [#allocation4], 0  ;;  %s534_s18 = smov [#allocation5]   ;;  %s535_s20 = smov [#allocation2]  }
   0x3   :  { %s30_s19 = sshll.u32 %s534_s18, 4  ;;  %s18_s21 = sshll.u32 %s535_s20, 4  ;;  %s31_s19 = int_to_ptr.vmem [resolvable:$true] %s30_s19  ;;  %s574_s21 = int_to_ptr.vmem [resolvable:$true] %s18_s21 }
   0x4   :  { %s440_s24 = scalar_lea.hbm %s645_s1, 1024 }
   0x5   :  { %p441_p0 = scmp.ne.s32.totalorder %s645_s1, %s440_s24  ;;  %p444_p1 = scmp.lt.u32.totalorder %s440_s24, %s645_s1 }
   0x7   :  { %p446_p2 = pnand %p444_p1, %p441_p0 }
   0x9   :  { %449 = shalt.err (!%p446_p2)
}
   0xa   :  { %s450_s29 = scalar_lea.vmem %s31_s19, 1024  ;;  %p455_p4 = scmp.lt.s32.totalorder %s31_s19, %s31_s19 }
   0xb   :  { %p451_p3 = scmp.ne.s32.totalorder %s31_s19, %s450_s29  ;;  %p456_p5 = scmp.lt.s32.totalorder %s450_s29, %s450_s29 }
   0xd   :  { %p457_p6 = por %p456_p5, %p455_p4 }
   0xf   :  { %p458_p7 = pnand %p457_p6, %p451_p3 }
  0x11   :  { %461 = shalt.err (!%p458_p7)
}
  0x12   :  { %s536_s30 = smov 64   ;;  %s537_s6 = smov 4  }
  0x13   :  { %36 = dma.hbm_to_vmem [thread:$0]  %s645_s1, 1024, %s31_s19, [#allocation6], %s536_s30, %s536_s30, %s537_s6  }
  0x14   :  { %s462_s11 = scalar_lea.hbm %s644_s0, 128 }
  0x15   :  { %p463_p8 = scmp.ne.s32.totalorder %s644_s0, %s462_s11  ;;  %p466_p9 = scmp.lt.u32.totalorder %s462_s11, %s644_s0 }
  0x17   :  { %p468_p10 = pnand %p466_p9, %p463_p8 }
  0x19   :  { %471 = shalt.err (!%p468_p10)
}
  0x1a   :  { %s472_s16 = scalar_lea.vmem %s574_s21, 128  ;;  %p477_p12 = scmp.lt.s32.totalorder %s574_s21, %s574_s21 }
  0x1b   :  { %p473_p11 = scmp.ne.s32.totalorder %s574_s21, %s472_s16  ;;  %p478_p13 = scmp.lt.s32.totalorder %s472_s16, %s472_s16 }
  0x1d   :  { %p479_p0 = por %p478_p13, %p477_p12 }
  0x1f   :  { %p480_p1 = pnand %p479_p0, %p473_p11 }
  0x21   :  { %483 = shalt.err (!%p480_p1)
}
  0x22   :  { %24 = dma.hbm_to_vmem [thread:$0]  %s644_s0, 128, %s574_s21, [#allocation3], %s536_s30, %s536_s30, %s537_s6  }
  0x23   :  { %s538_s18 = smov [#allocation7]   ;;  %s484_s23 = scalar_lea.hbm %s647_s3, 1024 }
  0x24   :  { %s44_s19 = sshll.u32 %s538_s18, 4  ;;  %p485_p2 = scmp.ne.s32.totalorder %s647_s3, %s484_s23  ;;  %s45_s19 = int_to_ptr.vmem [resolvable:$true] %s44_s19 }
  0x25   :  { %p488_p3 = scmp.lt.u32.totalorder %s484_s23, %s647_s3 }
  0x27   :  { %p490_p4 = pnand %p488_p3, %p485_p2 }
  0x29   :  { %493 = shalt.err (!%p490_p4)
}
  0x2a   :  { %s494_s28 = scalar_lea.vmem %s45_s19, 1024  ;;  %p499_p6 = scmp.lt.s32.totalorder %s45_s19, %s45_s19 }
  0x2b   :  { %p495_p5 = scmp.ne.s32.totalorder %s45_s19, %s494_s28  ;;  %p500_p7 = scmp.lt.s32.totalorder %s494_s28, %s494_s28 }
  0x2d   :  { %p501_p8 = por %p500_p7, %p499_p6 }
  0x2f   :  { %p502_p9 = pnand %p501_p8, %p495_p5 }
  0x31   :  { %505 = shalt.err (!%p502_p9)
}
  0x32   :  { %50 = dma.hbm_to_vmem [thread:$0]  %s647_s3, 1024, %s45_s19, [#allocation6], %s536_s30, %s536_s30, %s537_s6  }
  0x33   :  { %528 = dma.done.wait [#allocation3], 128  }
  0x34   :  { %529 = vsyncadd [#allocation3], 4294967168 }
  0x35   :  { %530 = dma.done.wait [#allocation6], 2048  }
  0x36   :  { %531 = vsyncadd [#allocation6], 4294965248  ;;  %v539_v0 = vmov 0.0   ;;  %vm540_vm0 = vmmov 0   ;;  %v415_v1 = vld [vmem:[#allocation5] sm:$0xff]   ;;  %v416_v2 = vld [vmem:[#allocation5 + $0x8] sm:$0xff]  }
  0x37   :  { %365 = vmatprep.subr.bf16.mxu0 %v539_v0  ;;  %381 = vmatprep.mubr.msk.bf16.mxu0 %vm540_vm0, %v539_v0  ;;  %v417_v3 = vld [vmem:[#allocation5 + $0x10] sm:$0xff]   ;;  %v424_v4 = vld [vmem:[#allocation7] sm:$0xff]   ;;  %v418_v5 = vld [vmem:[#allocation5 + $0x18] sm:$0xff]  }
  0x38   :  { %385 = vmatprep.subr.bf16.mxu1 %v539_v0  ;;  %401 = vmatprep.mubr.msk.bf16.mxu1 %vm540_vm0, %v539_v0  ;;  %v425_v6 = vld [vmem:[#allocation7 + $0x8] sm:$0xff]   ;;  %v419_v7 = vld [vmem:[#allocation5 + $0x20] sm:$0xff]   ;;  %v426_v8 = vld [vmem:[#allocation7 + $0x10] sm:$0xff]  }
  0x39   :  { %366 = vmatpush3.bf16.msra.mxu0 %v415_v1  ;;  %386 = vmatpush3.bf16.msra.mxu1 %v424_v4  ;;  %v420_v9 = vld [vmem:[#allocation5 + $0x28] sm:$0xff]   ;;  %v427_v10 = vld [vmem:[#allocation7 + $0x18] sm:$0xff]   ;;  %v421_v11 = vld [vmem:[#allocation5 + $0x30] sm:$0xff]  }
  0x3a   :  { %367 = vmatprep.subr.bf16.mxu0 %v539_v0  ;;  %387 = vmatprep.subr.bf16.mxu1 %v539_v0  ;;  %v428_v12 = vld [vmem:[#allocation7 + $0x20] sm:$0xff]   ;;  %v422_v13 = vld [vmem:[#allocation5 + $0x38] sm:$0xff]   ;;  %v429_v14 = vld [vmem:[#allocation7 + $0x28] sm:$0xff]  }
  0x3b   :  { %v423_v15 = vld [vmem:[#allocation2] sm:$0xff]   ;;  %v430_v16 = vld [vmem:[#allocation7 + $0x30] sm:$0xff]  }
  0x3c   :  { %v431_v17 = vld [vmem:[#allocation7 + $0x38] sm:$0xff]  }
  0x3d   :  { %368 = vmatpush3.bf16.msra.mxu0 %v416_v2  ;;  %388 = vmatpush3.bf16.msra.mxu1 %v425_v6  ;;  %v328_v18 = vld [vmem:[%s646_s2] ss:$0 sm:$0xff]  ;;  %s541_s2 = smov [#allocation8]  }
  0x3e   :  { %369 = vmatprep.subr.bf16.mxu0 %v539_v0  ;;  %389 = vmatprep.subr.bf16.mxu1 %v539_v0  ;;  %v338_v28 = vld [vmem:[%s648_s4] ss:$0 sm:$0xff]  ;;  %s315_s4 = sshll.u32 %s541_s2, 4  ;;  %s316_s4 = int_to_ptr.vmem [resolvable:$true] %s315_s4 }
  0x3f   :  { %s506_s7 = scalar_lea.vmem %s316_s4, 256  ;;  %p511_p11 = scmp.lt.s32.totalorder %s316_s4, %s316_s4 }
  0x40   :  { %p507_p10 = scmp.ne.s32.totalorder %s316_s4, %s506_s7  ;;  %p512_p12 = scmp.lt.s32.totalorder %s506_s7, %s506_s7 }
  0x41   :  { %370 = vmatpush3.bf16.msra.mxu0 %v417_v3  ;;  %390 = vmatpush3.bf16.msra.mxu1 %v426_v8 }
  0x42   :  { %371 = vmatprep.subr.bf16.mxu0 %v539_v0  ;;  %391 = vmatprep.subr.bf16.mxu1 %v539_v0  ;;  %p513_p13 = por %p512_p12, %p511_p11 }
  0x44   :  { %p514_p0 = pnand %p513_p13, %p507_p10 }
  0x45   :  { %372 = vmatpush3.bf16.msra.mxu0 %v418_v5  ;;  %392 = vmatpush3.bf16.msra.mxu1 %v427_v10 }
  0x46   :  { %373 = vmatprep.subr.bf16.mxu0 %v539_v0  ;;  %393 = vmatprep.subr.bf16.mxu1 %v539_v0 }
  0x49   :  { %374 = vmatpush3.bf16.msra.mxu0 %v419_v7  ;;  %394 = vmatpush3.bf16.msra.mxu1 %v428_v12 }
  0x4a   :  { %375 = vmatprep.subr.bf16.mxu0 %v539_v0  ;;  %395 = vmatprep.subr.bf16.mxu1 %v539_v0 }
  0x4d   :  { %376 = vmatpush3.bf16.msra.mxu0 %v420_v9  ;;  %396 = vmatpush3.bf16.msra.mxu1 %v429_v14 }
  0x4e   :  { %377 = vmatprep.subr.bf16.mxu0 %v539_v0  ;;  %397 = vmatprep.subr.bf16.mxu1 %v539_v0 }
  0x51   :  { %378 = vmatpush3.bf16.msra.mxu0 %v421_v11  ;;  %398 = vmatpush3.bf16.msra.mxu1 %v430_v16 }
  0x52   :  { %379 = vmatprep.subr.bf16.mxu0 %v539_v0  ;;  %399 = vmatprep.subr.bf16.mxu1 %v539_v0 }
  0x55   :  { %380 = vmatpush3.bf16.msra.mxu0 %v422_v13  ;;  %400 = vmatpush3.bf16.msra.mxu1 %v431_v17 }
  0x58   :  { %382 = vmatmul.mubr.bf16.vlgmr.msra.gmra.mrb[0].mxu0 %v423_v15 }
 0x12b   :  { %v176_v19 = vpop.f32.mrb[0].mxu0 }
 0x12c   :  { %v177_v20 = vadd.f32 %v328_v18, %v176_v19  ;;  %v383_v21 = vpop.f32.mrb[1].mxu0 }
 0x12d   :  { %v179_v22 = vpop.f32.mrb[2].mxu0 }
 0x12e   :  { %v180_v23 = vadd.f32 %v328_v18, %v179_v22  ;;  %v384_v24 = vpop.f32.mrb[3].mxu0  ;;  %v183_v25 = vmax.f32 %v177_v20, 0.0 }
 0x130   :  { %v184_v26 = vmax.f32 %v180_v23, 0.0 }
 0x132   :  { %v185_v27 = vpack.c.bf16 %v184_v26, %v183_v25 }
 0x134   :  { %402 = vmatmul.mubr.bf16.vlgmr.msra.gmra.mrb[0].mxu1 %v185_v27 }
 0x207   :  { %v291_v29 = vpop.f32.mrb[0].mxu1 }
 0x208   :  { %v292_v30 = vadd.f32 %v338_v28, %v291_v29  ;;  %v403_v31 = vpop.f32.mrb[1].mxu1 }
 0x209   :  { %v294_v32 = vpop.f32.mrb[2].mxu1 }
 0x20a   :  { %v298_v33 = vsub.f32 0.0, %v292_v30  ;;  %v295_v34 = vadd.f32 %v338_v28, %v294_v32  ;;  %v404_v35 = vpop.f32.mrb[3].mxu1 }
 0x20c   :  { %v300_v36 = vmul.f32 1.442695, %v298_v33  ;;  %v299_v37 = vsub.f32 0.0, %v295_v34 }
 0x20e   :  { %432 = vpow2.f32 %v300_v36  ;;  %v302_v38 = vmul.f32 1.442695, %v299_v37 }
 0x210   :  { %434 = vpow2.f32 %v302_v38 }
 0x218   :  { %v433_v39 = vpop.eup %432 }
 0x219   :  { %v304_v40 = vadd.f32 1.0, %v433_v39 }
 0x21a   :  { %v435_v41 = vpop.eup %434 }
 0x21b   :  { %436 = vrcp.f32 %v304_v40  ;;  %v305_v42 = vadd.f32 1.0, %v435_v41 }
 0x21d   :  { %438 = vrcp.f32 %v305_v42 }
 0x225   :  { %v437_v43 = vpop.eup %436 }
 0x226   :  { %308 = vst [vmem:[#allocation8] sm:$0xff] %v437_v43 }
 0x227   :  { %v439_v44 = vpop.eup %438 }
 0x228   :  { %309 = vst [vmem:[#allocation8 + $0x8] sm:$0xff] %v439_v44 }
 0x229   :  { %517 = shalt.err (!%p514_p0)
}
 0x22a   :  { %s518_s10 = scalar_lea.hbm %s649_s5, 256 }
 0x22b   :  { %p519_p1 = scmp.ne.s32.totalorder %s649_s5, %s518_s10  ;;  %p522_p2 = scmp.lt.u32.totalorder %s518_s10, %s649_s5 }
 0x22d   :  { %p524_p3 = pnand %p522_p2, %p519_p1 }
 0x22f   :  { %527 = shalt.err (!%p524_p3)
}
 0x230   :  { %s542_s15 = smov 128   ;;  %s543_s16 = smov 8  }
 0x231   :  { %321 = dma.vmem_to_hbm [thread:$0]  %s316_s4, 256, %s649_s5, [#allocation4], %s542_s15, %s542_s15, %s543_s16  }
 0x232   :  { %532 = dma.done.wait [#allocation4], 256  }
 0x233   :  { %533 = vsyncadd [#allocation4], 4294967040 }
 0x234   :  { %325 = vsyncpa [#allocation3], 1 }
 0x235   :  { %326 = vsyncpa [#allocation6], 1 }
 0x236   :  { %327 = vsyncpa [#allocation4], 1 }

</bundles_post_ra>
